<compile_context>
chip_gen: v7x
topology: tpu7x:2x2x1
jax: 0.10.0
libtpu: 0.0.40
codegen_flags: <defaults>
</compile_context>

<pallas_src>
import functools

import jax
import jax.numpy as jnp
from jax.experimental import pallas as pl
from jax.experimental.pallas import tpu as pltpu

_LANE = 128              # vreg lane width
_SUB = 8                 # sublane rows of the per-block partial output
_MAX_BLOCK_ROWS = 4096   # 4096 x 128 f32 = 2 MiB per input buffer


def _round_up(x, m):
    return ((x + m - 1) // m) * m


def _lsgan_partial_kernel(r_ref, out_ref, *, target_val, block_rows, total_rows):
    """Per-grid-step partial sum of squared differences.

    r_ref:   (block_rows, 128) tile of the flattened discriminator output,
             in its native dtype (upcast to f32 inside the kernel).
    out_ref: (8, 128) f32 lane-dense partial sum owned by this grid step.
    """
    x = r_ref[...].astype(jnp.float32)
    d = x - jnp.float32(target_val)
    sq = d * d

    def _reduce(v):
        # (block_rows, 128) -> (8, 128): vreg-wise VPU adds only (no XLU),
        # overlaps with the next block's DMA.
        return v.reshape(block_rows // _SUB, _SUB, _LANE).sum(axis=0)

    if total_rows % block_rows != 0:
        # Ragged row count: only the boundary (last) block pays for the mask.
        i = pl.program_id(0)
        last = pl.num_programs(0) - 1

        @pl.when(i == last)
        def _():
            row = jax.lax.broadcasted_iota(jnp.int32, (block_rows, 1), 0)
            valid = i * block_rows + row < total_rows
            out_ref[...] = _reduce(jnp.where(valid, sq, 0.0))

        @pl.when(i != last)
        def _():
            out_ref[...] = _reduce(sq)
    else:
        # Static fast path: block size evenly divides the row count.
        out_ref[...] = _reduce(sq)


@functools.partial(jax.jit, static_argnames=("is_real", "max_block_rows"))
def lsgan_loss(r, is_real: bool, max_block_rows: int = _MAX_BLOCK_ROWS):
    """loss = mean((r - 1)^2) if is_real else mean(r^2)  (== nn.MSELoss)."""
    n = r.size
    target_val = 1.0 if is_real else 0.0

    flat = r.reshape(-1)                 # native dtype: no wrapper-side cast
    lane_pad = (-n) % _LANE
    if lane_pad:
        # Sub-128-element tail pad (needed to form a (rows, 128) slab);
        # padding with the target value contributes exactly 0 to the SSD.
        # TODO(synk): this concat copies the flat array once in XLA for ragged
        # sizes; a 1-D BlockSpec would avoid it but is riskier to lower.
        flat = jnp.concatenate(
            [flat, jnp.full((lane_pad,), target_val, dtype=flat.dtype)]
        )
    rows = flat.size // _LANE
    x2d = flat.reshape(rows, _LANE)

    # Right-size the block: big for large inputs, single small block for tiny
    # ones (fast path).  Multiple of 16 keeps bf16 sublane packing happy.
    block_rows = min(max_block_rows, _round_up(rows, 16))
    num_blocks = pl.cdiv(rows, block_rows)

    kernel = functools.partial(
        _lsgan_partial_kernel,
        target_val=target_val,
        block_rows=block_rows,
        total_rows=rows,
    )

    bytes_in = rows * _LANE * x2d.dtype.itemsize
    bytes_out = num_blocks * _SUB * _LANE * 4
    partials = pl.pallas_call(
        kernel,
        out_shape=jax.ShapeDtypeStruct((num_blocks * _SUB, _LANE), jnp.float32),
        grid=(num_blocks,),
        in_specs=[pl.BlockSpec((block_rows, _LANE), lambda i: (i, 0))],
        out_specs=pl.BlockSpec((_SUB, _LANE), lambda i: (i, 0)),
        compiler_params=pltpu.CompilerParams(
            # independent partials: megacore-shardable on v7x
            dimension_semantics=("parallel",),
            # room for the 2 MiB double-buffered tiles + f32 temporaries,
            # still well under physical VMEM on every chip generation.
            vmem_limit_bytes=32 * 1024 * 1024,
        ),
        cost_estimate=pl.CostEstimate(
            flops=3 * rows * _LANE,
            transcendentals=0,
            bytes_accessed=bytes_in + bytes_out,
        ),
    )(x2d)

    # Tiny final reduction over the lane-dense partials, then the mean.
    return jnp.sum(partials) / jnp.float32(n)


if __name__ == "__main__":
    key = jax.random.PRNGKey(0)

    # Typical (small) discriminator output map, NCHW.
    r = jax.random.normal(key, (2, 4, 16, 16), dtype=jnp.float32)
    loss_real = lsgan_loss(r, True)
    loss_fake = lsgan_loss(r, False)
    jax.block_until_ready((loss_real, loss_fake))

    ref_real = jnp.mean((r - 1.0) ** 2)
    ref_fake = jnp.mean(r ** 2)
    assert jnp.allclose(loss_real, ref_real, rtol=1e-5, atol=1e-6)
    assert jnp.allclose(loss_fake, ref_fake, rtol=1e-5, atol=1e-6)

    # Ragged shape + bf16 input: exercises the boundary-row mask, the sub-128
    # tail pad, and the in-kernel upcast (accumulation stays f32).
    r2 = jax.random.normal(jax.random.PRNGKey(1), (2, 3, 30, 30)).astype(jnp.bfloat16)
    loss2 = lsgan_loss(r2, True)
    jax.block_until_ready(loss2)
    ref2 = jnp.mean((r2.astype(jnp.float32) - 1.0) ** 2)
    assert jnp.allclose(loss2, ref2, rtol=1e-5, atol=1e-6)

    # Multi-block ragged case (forced small blocks): exercises both pl.when
    # branches (unmasked hot blocks + masked boundary block) with a >1 grid.
    r3 = jax.random.normal(jax.random.PRNGKey(2), (2, 3, 30, 31), dtype=jnp.float32)
    loss3 = lsgan_loss(r3, False, max_block_rows=16)
    jax.block_until_ready(loss3)
    ref3 = jnp.mean(r3 ** 2)
    assert jnp.allclose(loss3, ref3, rtol=1e-5, atol=1e-6)

    print("KERNEL_OK")
</pallas_src>

<mosaic_0001>
module attributes {stable_mosaic.version = 11 : i64} {
  func.func @_lsgan_partial_kernel(%arg0: i32, %arg1: memref<16x128xf32, #tpu.memory_space<vmem>>, %arg2: memref<8x128xf32, #tpu.memory_space<vmem>>) attributes {dimension_semantics = [#tpu.dimension_semantics<parallel>], iteration_bounds = array<i64: 1>, scalar_prefetch = 0 : i64, scratch_operands = 0 : i64, tpu.core_type = #tpu.core_type<tc>, window_params = [{transform_indices = @transform_0, window_bounds = array<i64: 16, 128>}, {transform_indices = @transform_1, window_bounds = array<i64: 8, 128>}]} {
    %c0 = arith.constant 0 : index
    %c0_0 = arith.constant 0 : index
    %0 = vector.load %arg1[%c0, %c0_0] : memref<16x128xf32, #tpu.memory_space<vmem>>, vector<16x128xf32>
    %cst = arith.constant 1.000000e+00 : f32
    %1 = vector.broadcast %cst : f32 to vector<16x128xf32>
    %2 = arith.subf %0, %1 : vector<16x128xf32>
    %3 = arith.mulf %2, %2 : vector<16x128xf32>
    %4 = vector.shape_cast %3 : vector<16x128xf32> to vector<2x8x128xf32>
    %cst_1 = arith.constant dense<0.000000e+00> : vector<8x128xf32>
    %5 = vector.multi_reduction <add>, %4, %cst_1 [0] : vector<2x8x128xf32> to vector<8x128xf32>
    %c0_2 = arith.constant 0 : index
    %c0_3 = arith.constant 0 : index
    %6 = vector.load %arg2[%c0_2, %c0_3] : memref<8x128xf32, #tpu.memory_space<vmem>>, vector<8x128xf32>
    tpu.vector_store %arg2[%c0_2, %c0_3], %5 {strides = array<i32>} : memref<8x128xf32, #tpu.memory_space<vmem>>, vector<8x128xf32>,
    return
  }
  func.func @transform_0(%arg0: i32) -> (i32, i32) {
    %c0_i32 = arith.constant 0 : i32
    %c0_i32_0 = arith.constant 0 : i32
    return %arg0, %c0_i32 : i32, i32
  }
  func.func @transform_1(%arg0: i32) -> (i32, i32) {
    %c0_i32 = arith.constant 0 : i32
    %c0_i32_0 = arith.constant 0 : i32
    return %arg0, %c0_i32 : i32, i32
  }
}

</mosaic_0001>

<bundles_post_ra>
// kernel: lsgan_loss.1
= control target key start
LH: loop header
LB: loop body
LE: loop exit
PB: predicated region body
PF: predicated region fallthrough
CT: control target
= control target key end

     0   :  { %s41_s0 = inlined_call_operand.vmem [shape: f32[16,128], index: 0, kind: input, shape index: {}]   ;;  %s42_s1 = inlined_call_operand.vmem [shape: f32[8,128], index: 1, kind: output, shape index: {}]  }
   0x1   :  { %v8_v0 = vld [vmem:[%s41_s0] sm:$0xff]  ;;  %v9_v1 = vld [vmem:[%s41_s0 + $0x8] sm:$0xff] }
   0x2   :  { %v20_v2 = vadd.f32 -1.0, %v8_v0  ;;  %v21_v3 = vadd.f32 -1.0, %v9_v1 }
   0x4   :  { %v12_v4 = vmul.f32 %v20_v2, %v20_v2  ;;  %v13_v5 = vmul.f32 %v21_v3, %v21_v3 }
   0x6   :  { %v14_v6 = vadd.f32 %v13_v5, %v12_v4 }
   0x8   :  { %15 = vst [vmem:[%s42_s1] sm:$0xff] %v14_v6 }

</bundles_post_ra>
